<compile_context>
chip_gen: v6e
topology: v6e:2x2x1
jax: 0.10.0
libtpu: 0.0.40
codegen_flags: <defaults>
</compile_context>

<pallas_src>
import functools

import jax
import jax.numpy as jnp
from jax import lax
from jax.experimental import pallas as pl
from jax.experimental.pallas import tpu as pltpu


_UNROLL_CLASS_LIMIT = 16   # fully unroll the class loop when C <= this


def _poly_loss_kernel(pred_ref, lab_ref, out_ref, *, eps1, hw, tile_rows,
                      fold_rows, n_tiles, need_mask):
    """One grid step: (C, tile_rows, 128) logits + (tile_rows, 128) labels ->
    (fold_rows, 128) partial sums of  lse - (1+eps)*x_t  over the tile."""
    C = pred_ref.shape[0]
    j = pl.program_id(1)

    lab = lab_ref[...].astype(jnp.int32)          # widen int8 labels (VPU)

    # ---- class-axis reductions, reading/converting one class at a time ----
    if C <= _UNROLL_CLASS_LIMIT:
        m = pred_ref[0].astype(jnp.float32)
        for c in range(1, C):
            m = jnp.maximum(m, pred_ref[c].astype(jnp.float32))

        x0 = pred_ref[0].astype(jnp.float32)
        s = jnp.exp(x0 - m)
        xt = jnp.where(lab == 0, x0, 0.0)
        for c in range(1, C):
            xc = pred_ref[c].astype(jnp.float32)
            s = s + jnp.exp(xc - m)
            xt = xt + jnp.where(lab == c, xc, 0.0)
    else:
        def max_body(c, m):
            return jnp.maximum(m, pred_ref[c].astype(jnp.float32))
        m = lax.fori_loop(1, C, max_body, pred_ref[0].astype(jnp.float32),
                          unroll=8)

        def acc_body(c, carry):
            s, xt = carry
            xc = pred_ref[c].astype(jnp.float32)
            return (s + jnp.exp(xc - m),
                    xt + jnp.where(lab == c, xc, 0.0))
        zero = jnp.zeros_like(m)
        s, xt = lax.fori_loop(0, C, acc_body, (zero, zero), unroll=8)

    # per-pixel contribution: poly = (lse - (1+eps)*x_t) + eps ; "+eps" and /N
    # are applied once in the wrapper.
    contrib = (m + jnp.log(s)) - eps1 * xt

    def fold(v):
        # (tile_rows,128) -> (fold_rows,128): pure sublane-group split + adds.
        if fold_rows == tile_rows:
            return v
        return v.reshape(tile_rows // fold_rows, fold_rows, 128).sum(axis=0)

    if not need_mask:
        out_ref[...] = fold(contrib)
    else:
        def masked():
            row = lax.broadcasted_iota(jnp.int32, contrib.shape, 0)
            lane = lax.broadcasted_iota(jnp.int32, contrib.shape, 1)
            pix = (j * tile_rows + row) * 128 + lane
            out_ref[...] = fold(jnp.where(pix < hw, contrib, 0.0))

        if n_tiles == 1:
            masked()                                  # every step is the tail
        else:
            last = pl.num_programs(1) - 1
            pl.when(j == last)(masked)                # mask only the last tile

            @pl.when(j != last)
            def _():
                out_ref[...] = fold(contrib)


def _vmem_params():
    """(target logit block bytes, VMEM usage budget, scoped VMEM limit)."""
    try:
        kind = jax.devices()[0].device_kind.lower()
    except Exception:
        kind = ""
    if "v5" in kind or "v6" in kind:
        # 128 MiB physical VMEM: larger blocks amortize the ~0.35us/step cost.
        return 8 << 20, 48 << 20, 64 << 20
    # v7x (64 MiB VMEM per TC) and unknown chips: conservative sizing.
    return 4 << 20, 28 << 20, 40 << 20


def _choose_tile_rows(C, R, logit_bytes, label_bytes, target_block_bytes,
                      vmem_budget, max_tile_rows=None):
    """Rows of 128 pixels per grid step (multiple of 32 unless a single block
    covers the full extent)."""
    rows = target_block_bytes // max(1, C * 128 * logit_bytes)
    rows = max(32, (rows // 32) * 32)

    def vmem_bytes(r):
        pred_blk = C * r * 128 * logit_bytes
        lab_blk = r * 128 * label_bytes
        out_blk = 8 * 128 * 4
        temps = 7 * r * 128 * 4               # f32 working set (m, s, xt, ...)
        return 2 * (pred_blk + lab_blk + out_blk) + temps

    while rows > 32 and vmem_bytes(rows) > vmem_budget:
        rows -= 32
    if max_tile_rows is not None:             # test / tuning override
        rows = min(rows, max(32, (max_tile_rows // 32) * 32))
    if rows >= R:
        return R                              # one block covers the full extent
    return rows


def poly_loss(pred, target, *, epsilon=1.0, max_tile_rows=None):
    """pred: [B, C, H, W] float logits; target: [B, 1, H, W] integer labels."""
    B, C, H, W = pred.shape
    assert target.shape == (B, 1, H, W)
    HW = H * W
    N = B * HW
    R = pl.cdiv(HW, 128)

    # Labels travel as 1 byte/pixel whenever the class count allows it.
    if target.dtype in (jnp.int8, jnp.uint8, jnp.int16, jnp.uint16):
        lab_dtype = target.dtype
    elif C <= 127:
        lab_dtype = jnp.int8
    else:
        lab_dtype = jnp.int32

    pred3 = pred.reshape(B, C, HW)            # free reshape, no transpose
    lab3 = target.reshape(B, HW)
    if HW % 128 != 0:
        # TODO(synk): lane-unaligned H*W takes a full-tensor pad copy; aligned
        # shapes (H*W % 128 == 0, the common segmentation case) take zero copies.
        pad = R * 128 - HW
        pred3 = jnp.pad(pred3, ((0, 0), (0, 0), (0, pad)))
        lab3 = jnp.pad(lab3, ((0, 0), (0, pad)))
    pred4 = pred3.reshape(B, C, R, 128)
    lab4 = lab3.reshape(B, R, 128).astype(lab_dtype)

    target_block_bytes, vmem_budget, vmem_limit = _vmem_params()
    tile_rows = _choose_tile_rows(C, R, pred.dtype.itemsize,
                                  jnp.dtype(lab_dtype).itemsize,
                                  target_block_bytes, vmem_budget,
                                  max_tile_rows)
    n_tiles = pl.cdiv(R, tile_rows)
    fold_rows = 8 if tile_rows % 8 == 0 else tile_rows
    need_mask = (HW % (tile_rows * 128)) != 0   # ragged lane tail or partial tile

    kernel = functools.partial(
        _poly_loss_kernel,
        eps1=1.0 + float(epsilon), hw=HW, tile_rows=tile_rows,
        fold_rows=fold_rows, n_tiles=n_tiles, need_mask=need_mask)

    partials = pl.pallas_call(
        kernel,
        out_shape=jax.ShapeDtypeStruct((B, n_tiles, fold_rows, 128),
                                       jnp.float32),
        grid_spec=pltpu.PrefetchScalarGridSpec(
            num_scalar_prefetch=0,
            grid=(B, n_tiles),
            in_specs=[
                pl.BlockSpec((None, C, tile_rows, 128),
                             lambda b, j: (b, 0, j, 0)),
                pl.BlockSpec((None, tile_rows, 128),
                             lambda b, j: (b, j, 0)),
            ],
            out_specs=pl.BlockSpec((None, None, fold_rows, 128),
                                   lambda b, j: (b, j, 0, 0)),
        ),
        compiler_params=pltpu.CompilerParams(
            dimension_semantics=("parallel", "parallel"),
            vmem_limit_bytes=vmem_limit,
        ),
    )(pred4, lab4)

    # single small final reduction: mean(poly) = sum(contrib)/N + epsilon
    return jnp.sum(partials) / N + epsilon


def _poly_loss_ref(pred, target, epsilon=1.0):
    """Pure-JAX reference mirroring the PyTorch module (softmax=False, mean)."""
    B, C, H, W = pred.shape
    labels = target[:, 0].astype(jnp.int32)                      # (B, H, W)
    logits = pred.astype(jnp.float32)
    lse = jax.nn.logsumexp(logits, axis=1)                       # (B, H, W)
    onehot = jax.nn.one_hot(labels, C, axis=1, dtype=jnp.float32)
    x_t = jnp.sum(logits * onehot, axis=1)                       # (B, H, W)
    ce = lse - x_t
    poly = ce + epsilon * (1.0 - x_t)
    return jnp.mean(poly)


if __name__ == "__main__":
    key = jax.random.PRNGKey(0)

    def run_case(B, C, H, W, epsilon=1.0, max_tile_rows=None, seed_offset=0):
        k1, k2 = jax.random.split(jax.random.fold_in(key, seed_offset))
        pred = jax.random.normal(k1, (B, C, H, W), dtype=jnp.float32)
        target = jax.random.randint(k2, (B, 1, H, W), 0, C, dtype=jnp.int32)
        loss = jax.block_until_ready(
            poly_loss(pred, target, epsilon=epsilon,
                      max_tile_rows=max_tile_rows))
        ref = _poly_loss_ref(pred, target, epsilon=epsilon)
        assert jnp.allclose(loss, ref, rtol=1e-4, atol=1e-4), \
            ((B, C, H, W), loss, ref)

    # primary shape implied by the module (small segmentation map)
    run_case(2, 4, 16, 16)
    # lane-unaligned H*W: exercises the padded-pixel mask path
    run_case(2, 4, 10, 10, seed_offset=1)
    # multi-tile with partial last tile: exercises pl.when-gated mask + int8 labels
    run_case(1, 4, 65, 128, max_tile_rows=32, seed_offset=2)
    # many classes: exercises the lax.fori_loop class reduction
    run_case(1, 24, 16, 16, seed_offset=3)

    print("KERNEL_OK")
</pallas_src>

<mosaic_0001>
module attributes {stable_mosaic.version = 11 : i64} {
  func.func @_poly_loss_kernel(%arg0: i32, %arg1: i32, %arg2: memref<1x4x2x128xf32, #tpu.memory_space<vmem>>, %arg3: memref<1x2x128xi8, #tpu.memory_space<vmem>>, %arg4: memref<1x1x2x128xf32, #tpu.memory_space<vmem>>) attributes {dimension_semantics = [#tpu.dimension_semantics<parallel>, #tpu.dimension_semantics<parallel>], iteration_bounds = array<i64: 2, 1>, scalar_prefetch = 0 : i64, scratch_operands = 0 : i64, tpu.core_type = #tpu.core_type<tc>, window_params = [{transform_indices = @transform_0, window_bounds = array<i64: 1, 4, 2, 128>}, {transform_indices = @transform_1, window_bounds = array<i64: 1, 2, 128>}, {transform_indices = @transform_2, window_bounds = array<i64: 1, 1, 2, 128>}]} {
    %c0 = arith.constant 0 : index
    %c0_0 = arith.constant 0 : index
    %c0_1 = arith.constant 0 : index
    %0 = vector.load %arg3[%c0, %c0_0, %c0_1] : memref<1x2x128xi8, #tpu.memory_space<vmem>>, vector<1x2x128xi8>
    %1 = vector.shape_cast %0 : vector<1x2x128xi8> to vector<2x128xi8>
    %2 = arith.extsi %1 : vector<2x128xi8> to vector<2x128xi32>
    %c0_2 = arith.constant 0 : index
    %c0_3 = arith.constant 0 : index
    %c0_4 = arith.constant 0 : index
    %c0_5 = arith.constant 0 : index
    %3 = vector.load %arg2[%c0_2, %c0_3, %c0_4, %c0_5] : memref<1x4x2x128xf32, #tpu.memory_space<vmem>>, vector<1x1x2x128xf32>
    %4 = vector.shape_cast %3 : vector<1x1x2x128xf32> to vector<2x128xf32>
    %c0_6 = arith.constant 0 : index
    %c1 = arith.constant 1 : index
    %c0_7 = arith.constant 0 : index
    %c0_8 = arith.constant 0 : index
    %5 = vector.load %arg2[%c0_6, %c1, %c0_7, %c0_8] : memref<1x4x2x128xf32, #tpu.memory_space<vmem>>, vector<1x1x2x128xf32>
    %6 = vector.shape_cast %5 : vector<1x1x2x128xf32> to vector<2x128xf32>
    %7 = arith.maximumf %4, %6 : vector<2x128xf32>
    %c0_9 = arith.constant 0 : index
    %c2 = arith.constant 2 : index
    %c0_10 = arith.constant 0 : index
    %c0_11 = arith.constant 0 : index
    %8 = vector.load %arg2[%c0_9, %c2, %c0_10, %c0_11] : memref<1x4x2x128xf32, #tpu.memory_space<vmem>>, vector<1x1x2x128xf32>
    %9 = vector.shape_cast %8 : vector<1x1x2x128xf32> to vector<2x128xf32>
    %10 = arith.maximumf %7, %9 : vector<2x128xf32>
    %c0_12 = arith.constant 0 : index
    %c3 = arith.constant 3 : index
    %c0_13 = arith.constant 0 : index
    %c0_14 = arith.constant 0 : index
    %11 = vector.load %arg2[%c0_12, %c3, %c0_13, %c0_14] : memref<1x4x2x128xf32, #tpu.memory_space<vmem>>, vector<1x1x2x128xf32>
    %12 = vector.shape_cast %11 : vector<1x1x2x128xf32> to vector<2x128xf32>
    %13 = arith.maximumf %10, %12 : vector<2x128xf32>
    %c0_15 = arith.constant 0 : index
    %c0_16 = arith.constant 0 : index
    %c0_17 = arith.constant 0 : index
    %c0_18 = arith.constant 0 : index
    %14 = vector.load %arg2[%c0_15, %c0_16, %c0_17, %c0_18] : memref<1x4x2x128xf32, #tpu.memory_space<vmem>>, vector<1x1x2x128xf32>
    %15 = vector.shape_cast %14 : vector<1x1x2x128xf32> to vector<2x128xf32>
    %16 = arith.subf %15, %13 : vector<2x128xf32>
    %17 = math.exp %16 : vector<2x128xf32>
    %c0_i32 = arith.constant 0 : i32
    %18 = vector.broadcast %c0_i32 : i32 to vector<2x128xi32>
    %19 = arith.cmpi eq, %2, %18 : vector<2x128xi32>
    %cst = arith.constant 0.000000e+00 : f32
    %20 = vector.broadcast %cst : f32 to vector<2x128xf32>
    %21 = arith.select %19, %15, %20 : vector<2x128xi1>, vector<2x128xf32>
    %c0_19 = arith.constant 0 : index
    %c1_20 = arith.constant 1 : index
    %c0_21 = arith.constant 0 : index
    %c0_22 = arith.constant 0 : index
    %22 = vector.load %arg2[%c0_19, %c1_20, %c0_21, %c0_22] : memref<1x4x2x128xf32, #tpu.memory_space<vmem>>, vector<1x1x2x128xf32>
    %23 = vector.shape_cast %22 : vector<1x1x2x128xf32> to vector<2x128xf32>
    %24 = arith.subf %23, %13 : vector<2x128xf32>
    %25 = math.exp %24 : vector<2x128xf32>
    %26 = arith.addf %17, %25 : vector<2x128xf32>
    %c1_i32 = arith.constant 1 : i32
    %27 = vector.broadcast %c1_i32 : i32 to vector<2x128xi32>
    %28 = arith.cmpi eq, %2, %27 : vector<2x128xi32>
    %cst_23 = arith.constant 0.000000e+00 : f32
    %29 = vector.broadcast %cst_23 : f32 to vector<2x128xf32>
    %30 = arith.select %28, %23, %29 : vector<2x128xi1>, vector<2x128xf32>
    %31 = arith.addf %21, %30 : vector<2x128xf32>
    %c0_24 = arith.constant 0 : index
    %c2_25 = arith.constant 2 : index
    %c0_26 = arith.constant 0 : index
    %c0_27 = arith.constant 0 : index
    %32 = vector.load %arg2[%c0_24, %c2_25, %c0_26, %c0_27] : memref<1x4x2x128xf32, #tpu.memory_space<vmem>>, vector<1x1x2x128xf32>
    %33 = vector.shape_cast %32 : vector<1x1x2x128xf32> to vector<2x128xf32>
    %34 = arith.subf %33, %13 : vector<2x128xf32>
    %35 = math.exp %34 : vector<2x128xf32>
    %36 = arith.addf %26, %35 : vector<2x128xf32>
    %c2_i32 = arith.constant 2 : i32
    %37 = vector.broadcast %c2_i32 : i32 to vector<2x128xi32>
    %38 = arith.cmpi eq, %2, %37 : vector<2x128xi32>
    %cst_28 = arith.constant 0.000000e+00 : f32
    %39 = vector.broadcast %cst_28 : f32 to vector<2x128xf32>
    %40 = arith.select %38, %33, %39 : vector<2x128xi1>, vector<2x128xf32>
    %41 = arith.addf %31, %40 : vector<2x128xf32>
    %c0_29 = arith.constant 0 : index
    %c3_30 = arith.constant 3 : index
    %c0_31 = arith.constant 0 : index
    %c0_32 = arith.constant 0 : index
    %42 = vector.load %arg2[%c0_29, %c3_30, %c0_31, %c0_32] : memref<1x4x2x128xf32, #tpu.memory_space<vmem>>, vector<1x1x2x128xf32>
    %43 = vector.shape_cast %42 : vector<1x1x2x128xf32> to vector<2x128xf32>
    %44 = arith.subf %43, %13 : vector<2x128xf32>
    %45 = math.exp %44 : vector<2x128xf32>
    %46 = arith.addf %36, %45 : vector<2x128xf32>
    %c3_i32 = arith.constant 3 : i32
    %47 = vector.broadcast %c3_i32 : i32 to vector<2x128xi32>
    %48 = arith.cmpi eq, %2, %47 : vector<2x128xi32>
    %cst_33 = arith.constant 0.000000e+00 : f32
    %49 = vector.broadcast %cst_33 : f32 to vector<2x128xf32>
    %50 = arith.select %48, %43, %49 : vector<2x128xi1>, vector<2x128xf32>
    %51 = arith.addf %41, %50 : vector<2x128xf32>
    %52 = math.log %46 : vector<2x128xf32>
    %53 = arith.addf %13, %52 : vector<2x128xf32>
    %cst_34 = arith.constant 2.000000e+00 : f32
    %54 = vector.broadcast %cst_34 : f32 to vector<2x128xf32>
    %55 = arith.mulf %54, %51 : vector<2x128xf32>
    %56 = arith.subf %53, %55 : vector<2x128xf32>
    %c0_35 = arith.constant 0 : index
    %c0_36 = arith.constant 0 : index
    %c0_37 = arith.constant 0 : index
    %c0_38 = arith.constant 0 : index
    %57 = vector.load %arg4[%c0_35, %c0_36, %c0_37, %c0_38] : memref<1x1x2x128xf32, #tpu.memory_space<vmem>>, vector<1x1x2x128xf32>
    %58 = vector.shape_cast %57 : vector<1x1x2x128xf32> to vector<2x128xf32>
    %59 = vector.shape_cast %56 : vector<2x128xf32> to vector<1x1x2x128xf32>
    tpu.vector_store %arg4[%c0_35, %c0_36, %c0_37, %c0_38], %59 {strides = array<i32>} : memref<1x1x2x128xf32, #tpu.memory_space<vmem>>, vector<1x1x2x128xf32>,
    return
  }
  func.func @transform_0(%arg0: i32, %arg1: i32) -> (i32, i32, i32, i32) {
    %c0_i32 = arith.constant 0 : i32
    %c0_i32_0 = arith.constant 0 : i32
    %c0_i32_1 = arith.constant 0 : i32
    return %arg0, %c0_i32, %arg1, %c0_i32_0 : i32, i32, i32, i32
  }
  func.func @transform_1(%arg0: i32, %arg1: i32) -> (i32, i32, i32) {
    %c0_i32 = arith.constant 0 : i32
    %c0_i32_0 = arith.constant 0 : i32
    return %arg0, %arg1, %c0_i32 : i32, i32, i32
  }
  func.func @transform_2(%arg0: i32, %arg1: i32) -> (i32, i32, i32, i32) {
    %c0_i32 = arith.constant 0 : i32
    %c0_i32_0 = arith.constant 0 : i32
    %c0_i32_1 = arith.constant 0 : i32
    return %arg0, %arg1, %c0_i32, %c0_i32_0 : i32, i32, i32, i32
  }
}

</mosaic_0001>

<bundles_post_ra>
// kernel: tpu_custom_call.1
= control target key start
LH: loop header
LB: loop body
LE: loop exit
PB: predicated region body
PF: predicated region fallthrough
CT: control target
= control target key end

     0   :  { %7 = vsyncpa [#allocation3], 0  ;;  %s800_s0 = inlined_call_operand.hbm [shape: f32[2,4,2,128], index: 0, kind: input, shape index: {}]   ;;  %s801_s1 = inlined_call_operand.hbm [shape: s8[2,2,128], index: 1, kind: input, shape index: {}]   ;;  %s802_s2 = inlined_call_operand.hbm [shape: f32[2,1,2,128], index: 2, kind: output, shape index: {}]  }
   0x1   :  { %9 = vsyncpa [#allocation3 + $0x1], 0 }
   0x2   :  { %10 = vsyncpa [#allocation6], 0 }
   0x3   :  { %12 = vsyncpa [#allocation6 + $0x1], 0 }
   0x4   :  { %13 = vsyncpa [#allocation4], 0 }
   0x5   :  { %15 = vsyncpa [#allocation4 + $0x1], 0  ;;  %s637_s9 = smov 0   ;;  %s639_s10 = smov 0  }
   0x6   :  { %s641_s11 = smov 0   ;;  %s643_s12 = smov 0  }
   0x7   :  { %s645_s13 = smov 0   ;;  %s647_s14 = smov 0  }
   0x8 LB: > { %s377_s15 = sadd.s32 4294967295, %s615_s14   ;;  %s378_s16 = sadd.s32 4294967294, %s615_s14   ;;  %s615_s14 = sphi %s647_s14, %s21_s14   ;;  %s611_s13 = sphi %s645_s13, %s814_s13   ;;  %s607_s12 = sphi %s643_s12, %s813_s12   ;;  %s603_s11 = sphi %s641_s11, %s812_s11   ;;  %s599_s10 = sphi %s639_s10, %s811_s10   ;;  %s595_s9 = sphi %s637_s9, %s810_s9  }
   0x9   : > { %s33_s17 = sadd.s32 1, %s611_s13  ;;  %s42_s18 = sadd.s32 1, %s603_s11 }
   0xa   : > { %p35_p0 = scmp.ge.s32.totalorder %s33_s17, 2  ;;  %p49_p1 = scmp.ne.s32.totalorder %s603_s11, %s599_s10 }
   0xb   : > { %p50_p2 = scmp.eq.s32.totalorder %s615_s14, 0  ;;  %p55_p3 = scmp.ne.s32.totalorder %s599_s10, %s595_s9 }
   0xc   : > { %s816_s17 = smov (%p35_p0, %s33_s17), 0  ;;  %p56_p5 = scmp.eq.s32.totalorder %s377_s15, 0 }
   0xd   : > { %p678_p4 = por %p50_p2, %p49_p1  ;;  %s37_s20 = ssub.s32 %s611_s13, %s816_s17 }
   0xe   : > { %p109_p6 = scmp.eq.s32.totalorder %s377_s15, 1  ;;  %p40_p7 = scmp.eq.s32.totalorder %s37_s20, 0 }
   0xf   : > { %p684_p8 = por %p56_p5, %p55_p3  ;;  %p115_p10 = scmp.eq.s32.totalorder %s378_s16, 1 }
  0x10   : > { %p688_p9 = por %p109_p6, %p49_p1  ;;  %p413_p13 = scmp.lt.s32.totalorder %s615_s14, 2 }
  0x11   : > { %s693_s23 = scalar_select %p40_p7, %s603_s11, %s42_s18  }
  0x12   : > { %p695_p11 = por %p115_p10, %p55_p3  ;;  %s702_s25 = sand.u32 1, %s603_s11  }
  0x13   : > { %s381_s26 = sshll.u32 %s702_s25, 3  ;;  %s395_s27 = sshll.u32 %s611_s13, 7 }
  0x14   : > { %s146_s30 = scalar_lea.hbm %s800_s0, %s395_s27  ;;  %s139_s3 = scalar_lea.vmem [#allocation2], %s381_s26 }
  0x15   : > { %s147_s4 = sshll.u32 %s139_s3, 4  ;;  %p711_p0 = pnand %p413_p13, %p678_p4  ;;  %s148_s4 = int_to_ptr.vmem [resolvable:$true] %s147_s4 }
  0x16   : > { %p385_p1 = scmp.ge.s32.totalorder %s615_s14, 1  ;;  %s136_s6 = scalar_lea.sflag [#allocation3], %s702_s25 }
  0x17   : > { %p477_p2 = pneg %p711_p0  ;;  %s488_s7 = scalar_lea.vmem %s148_s4, 128 }
  0x18   : > { %p489_p3 = scmp.ne.s32.totalorder %s148_s4, %s488_s7  ;;  %s617_s8 = smov [#allocation2]  }
  0x19   : > { %s493_s15 = sshll.u32 %s617_s8, 4  ;;  %s494_s15 = int_to_ptr.vmem [resolvable:$false] %s493_s15 }
  0x1a   : > { %p491_p5 = pnand %p489_p3, %p477_p2  ;;  %s495_s16 = scalar_lea.vmem %s494_s15, 256 }
  0x1b   : > { %p496_p4 = scmp.lt.s32.totalorder %s148_s4, %s494_s15  ;;  %p497_p7 = scmp.lt.s32.totalorder %s495_s16, %s488_s7 }
  0x1c   : > { %p492_p6 = pneg %p491_p5 }
  0x1d   : > { %p498_p10 = por %p497_p7, %p496_p4 }
  0x1f   : > { %p499_p13 = pnand %p498_p10, %p492_p6 }
  0x21   : > { %502 = shalt.err (!%p499_p13)
}
  0x22   : > { %s618_s18 = smov 32   ;;  %s619_s19 = smov 2  }
  0x23   : > { %405 = dma.hbm_to_vmem [thread:$0]  (!%p711_p0), %s146_s30, 128, %s148_s4, %s136_s6, %s618_s18, %s618_s18, %s619_s19  }
  0x24   : > { %p173_p3 = scmp.lt.s32.totalorder %s615_s14, 3  ;;  %s384_s20 = sshll.u32 %s611_s13, 4 }
  0x25   : > { %s166_s29 = scalar_lea.hbm %s801_s1, %s384_s20  ;;  %s160_s3 = scalar_lea.vmem [#allocation5], %s702_s25 }
  0x26   : > { %p728_p5 = pnand %p385_p1, %p173_p3  ;;  %s168_s7 = sshll.u32 %s160_s3, 4  ;;  %s169_s7 = int_to_ptr.vmem [resolvable:$true] %s168_s7 }
  0x27   : > { %s158_s8 = scalar_lea.sflag [#allocation6], %s702_s25  ;;  %s516_s15 = scalar_lea.vmem %s169_s7, 16 }
  0x28   : > { %p517_p6 = scmp.ne.s32.totalorder %s169_s7, %s516_s15  ;;  %s620_s30 = smov [#allocation5]  }
  0x29   : > { %s521_s4 = sshll.u32 %s620_s30, 4  ;;  %s522_s4 = int_to_ptr.vmem [resolvable:$false] %s521_s4 }
  0x2a   : > { %p519_p4 = pnand %p517_p6, %p477_p2  ;;  %s523_s6 = scalar_lea.vmem %s522_s4, 32 }
  0x2b   : > { %p524_p1 = scmp.lt.s32.totalorder %s169_s7, %s522_s4  ;;  %p525_p10 = scmp.lt.s32.totalorder %s523_s6, %s516_s15 }
  0x2c   : > { %p520_p7 = pneg %p519_p4 }
  0x2d   : > { %p526_p13 = por %p525_p10, %p524_p1 }
  0x2f   : > { %p527_p3 = pnand %p526_p13, %p520_p7 }
  0x31   : > { %530 = shalt.err (!%p527_p3)
}
  0x32   : > { %408 = dma.hbm_to_vmem [thread:$0]  (!%p711_p0), %s166_s29, 16, %s169_s7, %s158_s8  }
  0x33   : > { %177 = sbr.rel (%p728_p5) target bundleno = 124 (0x7c), region = 28  ;;  %s745_s25 = sand.u32 (!%p728_p5), 1, %s599_s10  }
  0x34   : > { %s386_s16 = sshll.u32 (!%p728_p5), %s745_s25, 3  ;;  %s180_s18 = scalar_lea.sflag (!%p728_p5), [#allocation3], %s745_s25 }
  0x35   : > { %s183_s19 = scalar_lea.vmem (!%p728_p5), [#allocation2], %s386_s16 }
  0x38   : > { %582 = dma.done.wait (%p684_p8), %s180_s18, 128  }
  0x39   : > { %584 = vsyncadd (%p684_p8), %s180_s18, 4294967168  ;;  %s189_s5 = scalar_lea.sflag [#allocation6], %s745_s25  ;;  %s191_s20 = scalar_lea.vmem [#allocation5], %s745_s25 }
  0x3a   : > { %586 = dma.done.wait (%p684_p8), %s189_s5, 16  }
  0x3b   : > { %588 = vsyncadd (%p684_p8), %s189_s5, 4294967280  ;;  %v218_v0 = vld [vmem:[%s183_s19] sm:$0x3]  ;;  %v388_v1 = vld [vmem:[%s183_s19 + $0x2] sm:$0x3]  ;;  %s387_s21 = sshll.u32 %s745_s25, 1 }
  0x3c   : > { %v221_v2 = vmax.f32 %v218_v0, %v388_v1  ;;  %v389_v3 = vld [vmem:[%s183_s19 + $0x4] sm:$0x3]  ;;  %v390_v4 = vld [vmem:[%s183_s19 + $0x6] sm:$0x3]  ;;  %v216_v15 = vld [vmem:[%s191_s20] sm:$0x1] }
  0x3d   : > { %v217_v17 = vunpack.c.0.s8 %v216_v15  ;;  %s215_s26 = scalar_lea.vmem [#allocation7], %s387_s21  ;;  %s392_s28 = sshll.u32 %s607_s12, 5 }
  0x3e   : > { %v224_v5 = vmax.f32 %v221_v2, %v389_v3  ;;  %s275_s27 = sshll.u32 %s215_s26, 4  ;;  %s273_s7 = scalar_lea.hbm %s802_s2, %s392_s28  ;;  %s276_s27 = int_to_ptr.vmem [resolvable:$true] %s275_s27 }
  0x3f   : > { %vm231_vm0 = vcmp.eq.s32.totalorder %v217_v17, 0  ;;  %vm237_vm1 = vcmp.eq.s32.totalorder %v217_v17, 1  ;;  %vm244_vm2 = vcmp.eq.s32.totalorder %v217_v17, 2  ;;  %vm251_vm3 = vcmp.eq.s32.totalorder %v217_v17, 3  ;;  %s261_s8 = scalar_lea.sflag [#allocation4], %s745_s25  ;;  %s531_s15 = scalar_lea.vmem %s276_s27, 32 }
  0x40   : > { %v227_v6 = vmax.f32 %v224_v5, %v390_v4  ;;  %v232_v24 = vsel %vm231_vm0, %v218_v0, 0.0  ;;  %v238_v25 = vsel %vm237_vm1, %v388_v1, 0.0  ;;  %v245_v27 = vsel %vm244_vm2, %v389_v3, 0.0  ;;  %p532_p8 = scmp.ne.s32.totalorder %s276_s27, %s531_s15  ;;  %s621_s30 = smov [#allocation7]  }
  0x41   : > { %v239_v26 = vadd.f32 %v238_v25, %v232_v24  ;;  %v252_v29 = vsel %vm251_vm3, %v390_v4, 0.0  ;;  %s535_s4 = sshll.u32 %s621_s30, 4  ;;  %s536_s4 = int_to_ptr.vmem [resolvable:$false] %s535_s4 }
  0x42   : > { %v228_v7 = vsub.f32 %v218_v0, %v227_v6  ;;  %v233_v8 = vsub.f32 %v388_v1, %v227_v6  ;;  %v240_v9 = vsub.f32 %v389_v3, %v227_v6  ;;  %v247_v10 = vsub.f32 %v390_v4, %v227_v6  ;;  %p533_p0 = pnand %p532_p8, %p688_p9  ;;  %s537_s6 = scalar_lea.vmem %s536_s4, 64 }
  0x43   : > { %v246_v28 = vadd.f32 %v245_v27, %v239_v26  ;;  %p538_p5 = scmp.lt.s32.totalorder %s276_s27, %s536_s4  ;;  %p539_p6 = scmp.lt.s32.totalorder %s537_s6, %s531_s15 }
  0x44   : > { %v229_v11 = vmul.f32 1.442695, %v228_v7  ;;  %v234_v12 = vmul.f32 1.442695, %v233_v8  ;;  %v241_v13 = vmul.f32 1.442695, %v240_v9  ;;  %p534_p2 = pneg %p533_p0 }
  0x45   : > { %v248_v14 = vmul.f32 1.442695, %v247_v10  ;;  %v253_v30 = vadd.f32 %v252_v29, %v246_v28  ;;  %p540_p4 = por %p539_p6, %p538_p5 }
  0x46   : > { %465 = vpow2.f32 %v229_v11 }
  0x47   : > { %467 = vpow2.f32 %v234_v12  ;;  %v257_v33 = vmul.f32 2.0, %v253_v30  ;;  %p541_p7 = pnand %p540_p4, %p534_p2 }
  0x48   : > { %469 = vpow2.f32 %v241_v13 }
  0x49   : > { %471 = vpow2.f32 %v248_v14 }
  0x53   : > { %v466_v16 = vpop.eup %465 }
  0x54   : > { %v468_v18 = vpop.eup %467 }
  0x55   : > { %v470_v19 = vpop.eup %469  ;;  %v236_v20 = vadd.f32 %v468_v18, %v466_v16 }
  0x56   : > { %v472_v21 = vpop.eup %471 }
  0x57   : > { %v243_v22 = vadd.f32 %v470_v19, %v236_v20 }
  0x59   : > { %v250_v23 = vadd.f32 %v472_v21, %v243_v22 }
  0x5b   : > { %473 = vlog2.f32 %v250_v23 }
  0x68   : > { %v474_v31 = vpop.eup %473 }
  0x69   : > { %v255_v32 = vmul.f32 0.6931472, %v474_v31 }
  0x6b   : > { %v256_v34 = vadd.f32 %v255_v32, %v227_v6 }
  0x6d   : > { %v258_v35 = vsub.f32 %v256_v34, %v257_v33 }
  0x6f   : > { %259 = vst [vmem:[%s215_s26] sm:$0x3] %v258_v35 }
  0x70   : > { %544 = shalt.err (!%p541_p7)
}
  0x71   : > { %s545_s12 = scalar_lea.hbm %s273_s7, 32  ;;  %s549_s18 = scalar_lea.hbm %s802_s2, 64 }
  0x72   : > { %p546_p1 = scmp.ne.s32.totalorder %s273_s7, %s545_s12  ;;  %p550_p3 = scmp.lt.s32.totalorder %s273_s7, %s802_s2 }
  0x73   : > { %p551_p8 = scmp.lt.s32.totalorder %s549_s18, %s545_s12 }
  0x74   : > { %p547_p10 = pnand %p546_p1, %p688_p9 }
  0x75   : > { %p552_p0 = por %p551_p8, %p550_p3 }
  0x76   : > { %p548_p13 = pneg %p547_p10 }
  0x78   : > { %p553_p12 = pnand %p552_p0, %p548_p13 }
  0x7a   : > { %556 = shalt.err (!%p553_p12)
}
  0x7b   : > { %400 = dma.vmem_to_hbm [thread:$0]  (%p688_p9), %s276_s27, 32, %s273_s7, %s261_s8  }
  0x7c PF: > { %s287_s20 = sand.u32 1, %s595_s9   ;;  %p809_p2 = scmp.ge.s32.totalorder %s615_s14, 2 }
  0x7d   : > { %s288_s21 = scalar_lea.sflag [#allocation4], %s287_s20 }
  0x7e   : > { %p410_p5 = pnand %p809_p2, %p695_p11 }
  0x80   : > { %p411_p6 = pneg %p410_p5 }
  0x82   : > { %590 = dma.done.wait (%p411_p6), %s288_s21, 32  }
  0x83   : > { %592 = vsyncadd (%p411_p6), %s288_s21, 4294967264  ;;  %s21_s14 = sadd.s32 1, %s615_s14   ;;  %s810_s9 = smov %s599_s10 }
  0x84   : > { %p18_p4 = scmp.ge.s32.totalorder %s21_s14, 4   ;;  %s811_s10 = smov %s603_s11 }
  0x85   : > { %s812_s11 = smov %s693_s23  ;;  %s813_s12 = smov %s611_s13 }
  0x86   : > { %s814_s13 = smov %s816_s17  ;;  %20 = sbr.rel (!%p18_p4) target bundleno = 8 (0x8), region = 89 }
  0x8b   :  { %293 = vsyncpa [#allocation3], 1 }
  0x8c   :  { %295 = vsyncpa [#allocation3 + $0x1], 1 }
  0x8d   :  { %296 = vsyncpa [#allocation6], 1 }
  0x8e   :  { %298 = vsyncpa [#allocation6 + $0x1], 1 }
  0x8f   :  { %299 = vsyncpa [#allocation4], 1 }
  0x90   :  { %301 = vsyncpa [#allocation4 + $0x1], 1 }

</bundles_post_ra>
